<compile_context>
chip_gen: v5e
topology: v5e:2x2
jax: 0.10.0
libtpu: 0.0.40
codegen_flags: <defaults>
</compile_context>

<pallas_src>
import functools

import jax
import jax.numpy as jnp
import numpy as np
from jax.experimental import pallas as pl
from jax.experimental.pallas import tpu as pltpu


# ----------------------------- Pallas kernel ------------------------------ #
def _convlstm_kernel(patches_ref, w_ref, b_ref, c_ref, wci_ref, wcf_ref,
                     wco_ref, hid_ref, ctx_ref, *, HC):
    # patches_ref : (KH*KW*CT, hw_tile)  im2col columns for this spatial strip
    # w_ref       : (4*HC, KH*KW*CT)     fused conv weight
    # b_ref       : (4*HC, 1)            conv bias (broadcasts over lanes)
    # c_ref       : (HC, hw_tile)        previous cell state
    # wci/wcf/wco : (HC, hw_tile)        peephole params (zeros at init)
    # hid/ctx_ref : (HC, hw_tile)        outputs (lane-dense stores)

    # --- whole conv as a single MXU matmul: K = KH*KW*CT, N = hw_tile ---
    gates = jnp.dot(w_ref[...], patches_ref[...],
                    preferred_element_type=jnp.float32)
    gates = gates + b_ref[...]                      # (4*HC, 1) over lanes

    # --- gate split (PyTorch chunk order i, f, c, o) -> sublane slices ---
    i_g = gates[0 * HC:1 * HC, :]
    f_g = gates[1 * HC:2 * HC, :]
    g_g = gates[2 * HC:3 * HC, :]
    o_g = gates[3 * HC:4 * HC, :]

    c_prev = c_ref[...].astype(jnp.float32)
    wci = wci_ref[...].astype(jnp.float32)
    wcf = wcf_ref[...].astype(jnp.float32)
    wco = wco_ref[...].astype(jnp.float32)

    # --- LSTM cell elementwise math (VPU/EUP), full-lane occupancy ---
    ctx = (jax.nn.sigmoid(f_g + wcf * c_prev) * c_prev +
           jax.nn.sigmoid(i_g + wci * c_prev) * jnp.tanh(g_g))
    hid = jax.nn.sigmoid(o_g + wco * ctx) * jnp.tanh(ctx)

    hid_ref[...] = hid.astype(hid_ref.dtype)
    ctx_ref[...] = ctx.astype(ctx_ref.dtype)


# ------------------------------- wrapper ---------------------------------- #
def _pick_hw_tile(hw, k_depth, max_block_bytes=4 << 20):
    """Largest multiple-of-128 divisor of hw whose im2col block fits budget."""
    if hw % 128 != 0:
        return hw
    tile = 128
    while hw % (tile * 2) == 0 and k_depth * (tile * 2) * 4 <= max_block_bytes:
        tile *= 2
    return tile


def conv_lstm_cell(x, hc, weight, bias, wci, wcf, wco, kernel_size=(3, 3)):
    """x: (B, Cin, H, W) NCHW; hc = (h, c) each (B, HC, H, W) NCHW.
    weight: (4*HC, Cin+HC, KH, KW) OIHW; bias: (4*HC,);
    wci/wcf/wco: (1, HC, H, W).  Returns (hidden, (hidden, context)) in NCHW."""
    h, c = hc
    B, Cin, H, W = x.shape
    HC = c.shape[1]
    KH, KW = kernel_size
    CT = Cin + HC
    HW = H * W
    K_DEPTH = KH * KW * CT

    # --- glue (plain XLA): concat, "same" pad, im2col, weight fusion ---
    xh = jnp.concatenate([x, h], axis=1)                       # (B, CT, H, W)
    xh_pad = jnp.pad(xh, ((0, 0), (0, 0),
                          (KH // 2, KH // 2), (KW // 2, KW // 2)))
    cols = [xh_pad[:, :, kh:kh + H, kw:kw + W]
            for kh in range(KH) for kw in range(KW)]
    patches = jnp.stack(cols, axis=1).reshape(B, K_DEPTH, HW)

    # OIHW -> (O, KH, KW, I) -> (4*HC, KH*KW*CT), matching the im2col K order.
    w_mat = jnp.transpose(weight, (0, 2, 3, 1)).reshape(4 * HC, K_DEPTH)
    b_col = bias.reshape(4 * HC, 1)

    c_flat = c.reshape(B, HC, HW)
    wci_flat = wci.reshape(HC, HW)
    wcf_flat = wcf.reshape(HC, HW)
    wco_flat = wco.reshape(HC, HW)

    # TODO(synk): optionally cast patches/w_mat to bf16 for ~2x MXU throughput
    # on v6e/v7x (needs a looser numerical tolerance than 1e-5).

    hw_tile = _pick_hw_tile(HW, K_DEPTH)
    grid = (B, HW // hw_tile)

    kernel = functools.partial(_convlstm_kernel, HC=HC)

    hid_flat, ctx_flat = pl.pallas_call(
        kernel,
        out_shape=(jax.ShapeDtypeStruct((B, HC, HW), x.dtype),
                   jax.ShapeDtypeStruct((B, HC, HW), x.dtype)),
        grid_spec=pltpu.PrefetchScalarGridSpec(
            num_scalar_prefetch=0,
            grid=grid,
            in_specs=[
                pl.BlockSpec((pl.Squeezed(), K_DEPTH, hw_tile),
                             lambda b, s: (b, 0, s)),             # im2col
                pl.BlockSpec((4 * HC, K_DEPTH), lambda b, s: (0, 0)),  # weight
                pl.BlockSpec((4 * HC, 1), lambda b, s: (0, 0)),        # bias
                pl.BlockSpec((pl.Squeezed(), HC, hw_tile),
                             lambda b, s: (b, 0, s)),             # c_prev
                pl.BlockSpec((HC, hw_tile), lambda b, s: (0, s)),      # wci
                pl.BlockSpec((HC, hw_tile), lambda b, s: (0, s)),      # wcf
                pl.BlockSpec((HC, hw_tile), lambda b, s: (0, s)),      # wco
            ],
            out_specs=[
                pl.BlockSpec((pl.Squeezed(), HC, hw_tile),
                             lambda b, s: (b, 0, s)),
                pl.BlockSpec((pl.Squeezed(), HC, hw_tile),
                             lambda b, s: (b, 0, s)),
            ],
        ),
        compiler_params=pltpu.CompilerParams(
            dimension_semantics=("parallel", "parallel")),
    )(patches, w_mat, b_col, c_flat, wci_flat, wcf_flat, wco_flat)

    hidden = hid_flat.reshape(B, HC, H, W)
    context = ctx_flat.reshape(B, HC, H, W)
    return hidden, (hidden, context)


# --------------------------- pure-JAX reference ---------------------------- #
def _ref_forward(x, h, c, weight, bias, wci, wcf, wco):
    xh = jnp.concatenate([x, h], axis=1)
    gates = jax.lax.conv_general_dilated(
        xh, weight, window_strides=(1, 1), padding=((1, 1), (1, 1)),
        dimension_numbers=("NCHW", "OIHW", "NCHW")) + bias[None, :, None, None]
    i_g, f_g, g_g, o_g = jnp.split(gates, 4, axis=1)
    ctx = (jax.nn.sigmoid(f_g + wcf * c) * c +
           jax.nn.sigmoid(i_g + wci * c) * jnp.tanh(g_g))
    hid = jax.nn.sigmoid(o_g + wco * ctx) * jnp.tanh(ctx)
    return hid, ctx


if __name__ == "__main__":
    B, Cin, HC, H, W, K = 2, 4, 8, 16, 16, 3

    key = jax.random.PRNGKey(0)
    kx, kh, kc, kw_, kb = jax.random.split(key, 5)

    x = jax.random.normal(kx, (B, Cin, H, W), jnp.float32)
    h = jax.random.normal(kh, (B, HC, H, W), jnp.float32)
    c = jax.random.normal(kc, (B, HC, H, W), jnp.float32)

    # deterministic parameter init (Conv2d weight OIHW + bias); peephole
    # params Wci/Wcf/Wco are zero-initialized, exactly as in the module.
    weight = jax.random.normal(kw_, (4 * HC, Cin + HC, K, K), jnp.float32) * 0.1
    bias = jax.random.normal(kb, (4 * HC,), jnp.float32) * 0.1
    wci = jnp.zeros((1, HC, H, W), jnp.float32)
    wcf = jnp.zeros((1, HC, H, W), jnp.float32)
    wco = jnp.zeros((1, HC, H, W), jnp.float32)

    hidden, (hidden2, context) = jax.jit(conv_lstm_cell)(
        x, (h, c), weight, bias, wci, wcf, wco)
    jax.block_until_ready((hidden, context))

    hid_ref, ctx_ref = _ref_forward(x, h, c, weight, bias, wci, wcf, wco)
    np.testing.assert_allclose(np.asarray(hidden), np.asarray(hid_ref),
                               rtol=1e-5, atol=1e-5)
    np.testing.assert_allclose(np.asarray(context), np.asarray(ctx_ref),
                               rtol=1e-5, atol=1e-5)

    print("KERNEL_OK")
</pallas_src>

<mosaic_0001>
module attributes {stable_mosaic.version = 11 : i64} {
  func.func @_convlstm_kernel(%arg0: i32, %arg1: i32, %arg2: memref<1x108x256xf32, #tpu.memory_space<vmem>>, %arg3: memref<32x108xf32, #tpu.memory_space<vmem>>, %arg4: memref<32x1xf32, #tpu.memory_space<vmem>>, %arg5: memref<1x8x256xf32, #tpu.memory_space<vmem>>, %arg6: memref<8x256xf32, #tpu.memory_space<vmem>>, %arg7: memref<8x256xf32, #tpu.memory_space<vmem>>, %arg8: memref<8x256xf32, #tpu.memory_space<vmem>>, %arg9: memref<1x8x256xf32, #tpu.memory_space<vmem>>, %arg10: memref<1x8x256xf32, #tpu.memory_space<vmem>>) attributes {dimension_semantics = [#tpu.dimension_semantics<parallel>, #tpu.dimension_semantics<parallel>], iteration_bounds = array<i64: 2, 1>, scalar_prefetch = 0 : i64, scratch_operands = 0 : i64, tpu.core_type = #tpu.core_type<tc>, window_params = [{transform_indices = @transform_0, window_bounds = array<i64: 1, 108, 256>}, {pipeline_mode = #tpu.pipeline_mode<synchronous>, transform_indices = @transform_1, window_bounds = array<i64: 32, 108>}, {pipeline_mode = #tpu.pipeline_mode<synchronous>, transform_indices = @transform_2, window_bounds = array<i64: 32, 1>}, {transform_indices = @transform_3, window_bounds = array<i64: 1, 8, 256>}, {transform_indices = @transform_4, window_bounds = array<i64: 8, 256>}, {transform_indices = @transform_5, window_bounds = array<i64: 8, 256>}, {transform_indices = @transform_6, window_bounds = array<i64: 8, 256>}, {transform_indices = @transform_7, window_bounds = array<i64: 1, 8, 256>}, {transform_indices = @transform_8, window_bounds = array<i64: 1, 8, 256>}]} {
    %c0 = arith.constant 0 : index
    %c0_0 = arith.constant 0 : index
    %0 = vector.load %arg3[%c0, %c0_0] : memref<32x108xf32, #tpu.memory_space<vmem>>, vector<32x108xf32>
    %c0_1 = arith.constant 0 : index
    %c0_2 = arith.constant 0 : index
    %c0_3 = arith.constant 0 : index
    %1 = vector.load %arg2[%c0_1, %c0_2, %c0_3] : memref<1x108x256xf32, #tpu.memory_space<vmem>>, vector<1x108x256xf32>
    %2 = vector.shape_cast %1 : vector<1x108x256xf32> to vector<108x256xf32>
    %cst = arith.constant dense<0.000000e+00> : vector<32x256xf32>
    %3 = tpu.matmul %0, %2, %cst {dimension_numbers = #tpu.dot_dimension_numbers<[1], [0], [0], [1], [0, 0, 1, 1], [], []>} : vector<32x108xf32>, vector<108x256xf32>, vector<32x256xf32> -> vector<32x256xf32>
    %c0_4 = arith.constant 0 : index
    %c0_5 = arith.constant 0 : index
    %4 = vector.load %arg4[%c0_4, %c0_5] : memref<32x1xf32, #tpu.memory_space<vmem>>, vector<32x1xf32>
    %5 = vector.broadcast %4 : vector<32x1xf32> to vector<32x256xf32>
    %6 = arith.addf %3, %5 : vector<32x256xf32>
    %7 = vector.extract_strided_slice %6 {offsets = [0, 0], sizes = [8, 256], strides = [1, 1]} : vector<32x256xf32> to vector<8x256xf32>
    %8 = vector.extract_strided_slice %6 {offsets = [8, 0], sizes = [8, 256], strides = [1, 1]} : vector<32x256xf32> to vector<8x256xf32>
    %9 = vector.extract_strided_slice %6 {offsets = [16, 0], sizes = [8, 256], strides = [1, 1]} : vector<32x256xf32> to vector<8x256xf32>
    %10 = vector.extract_strided_slice %6 {offsets = [24, 0], sizes = [8, 256], strides = [1, 1]} : vector<32x256xf32> to vector<8x256xf32>
    %c0_6 = arith.constant 0 : index
    %c0_7 = arith.constant 0 : index
    %c0_8 = arith.constant 0 : index
    %11 = vector.load %arg5[%c0_6, %c0_7, %c0_8] : memref<1x8x256xf32, #tpu.memory_space<vmem>>, vector<1x8x256xf32>
    %12 = vector.shape_cast %11 : vector<1x8x256xf32> to vector<8x256xf32>
    %c0_9 = arith.constant 0 : index
    %c0_10 = arith.constant 0 : index
    %13 = vector.load %arg6[%c0_9, %c0_10] : memref<8x256xf32, #tpu.memory_space<vmem>>, vector<8x256xf32>
    %c0_11 = arith.constant 0 : index
    %c0_12 = arith.constant 0 : index
    %14 = vector.load %arg7[%c0_11, %c0_12] : memref<8x256xf32, #tpu.memory_space<vmem>>, vector<8x256xf32>
    %c0_13 = arith.constant 0 : index
    %c0_14 = arith.constant 0 : index
    %15 = vector.load %arg8[%c0_13, %c0_14] : memref<8x256xf32, #tpu.memory_space<vmem>>, vector<8x256xf32>
    %16 = arith.mulf %14, %12 : vector<8x256xf32>
    %17 = arith.addf %8, %16 : vector<8x256xf32>
    %18 = arith.negf %17 : vector<8x256xf32>
    %19 = math.exp %18 : vector<8x256xf32>
    %cst_15 = arith.constant 1.000000e+00 : f32
    %20 = vector.broadcast %cst_15 : f32 to vector<8x256xf32>
    %21 = arith.addf %20, %19 : vector<8x256xf32>
    %22 = arith.divf %20, %21 : vector<8x256xf32>
    %23 = arith.mulf %22, %12 : vector<8x256xf32>
    %24 = arith.mulf %13, %12 : vector<8x256xf32>
    %25 = arith.addf %7, %24 : vector<8x256xf32>
    %26 = arith.negf %25 : vector<8x256xf32>
    %27 = math.exp %26 : vector<8x256xf32>
    %cst_16 = arith.constant 1.000000e+00 : f32
    %28 = vector.broadcast %cst_16 : f32 to vector<8x256xf32>
    %29 = arith.addf %28, %27 : vector<8x256xf32>
    %30 = arith.divf %28, %29 : vector<8x256xf32>
    %31 = math.tanh %9 : vector<8x256xf32>
    %32 = arith.mulf %30, %31 : vector<8x256xf32>
    %33 = arith.addf %23, %32 : vector<8x256xf32>
    %34 = arith.mulf %15, %33 : vector<8x256xf32>
    %35 = arith.addf %10, %34 : vector<8x256xf32>
    %36 = arith.negf %35 : vector<8x256xf32>
    %37 = math.exp %36 : vector<8x256xf32>
    %cst_17 = arith.constant 1.000000e+00 : f32
    %38 = vector.broadcast %cst_17 : f32 to vector<8x256xf32>
    %39 = arith.addf %38, %37 : vector<8x256xf32>
    %40 = arith.divf %38, %39 : vector<8x256xf32>
    %41 = math.tanh %33 : vector<8x256xf32>
    %42 = arith.mulf %40, %41 : vector<8x256xf32>
    %c0_18 = arith.constant 0 : index
    %c0_19 = arith.constant 0 : index
    %c0_20 = arith.constant 0 : index
    %43 = vector.load %arg9[%c0_18, %c0_19, %c0_20] : memref<1x8x256xf32, #tpu.memory_space<vmem>>, vector<1x8x256xf32>
    %44 = vector.shape_cast %43 : vector<1x8x256xf32> to vector<8x256xf32>
    %45 = vector.shape_cast %42 : vector<8x256xf32> to vector<1x8x256xf32>
    tpu.vector_store %arg9[%c0_18, %c0_19, %c0_20], %45 {strides = array<i32>} : memref<1x8x256xf32, #tpu.memory_space<vmem>>, vector<1x8x256xf32>,
    %c0_21 = arith.constant 0 : index
    %c0_22 = arith.constant 0 : index
    %c0_23 = arith.constant 0 : index
    %46 = vector.load %arg10[%c0_21, %c0_22, %c0_23] : memref<1x8x256xf32, #tpu.memory_space<vmem>>, vector<1x8x256xf32>
    %47 = vector.shape_cast %46 : vector<1x8x256xf32> to vector<8x256xf32>
    %48 = vector.shape_cast %33 : vector<8x256xf32> to vector<1x8x256xf32>
    tpu.vector_store %arg10[%c0_21, %c0_22, %c0_23], %48 {strides = array<i32>} : memref<1x8x256xf32, #tpu.memory_space<vmem>>, vector<1x8x256xf32>,
    return
  }
  func.func @transform_0(%arg0: i32, %arg1: i32) -> (i32, i32, i32) {
    %c0_i32 = arith.constant 0 : i32
    %c0_i32_0 = arith.constant 0 : i32
    return %arg0, %c0_i32, %arg1 : i32, i32, i32
  }
  func.func @transform_1(%arg0: i32, %arg1: i32) -> (i32, i32) {
    %c0_i32 = arith.constant 0 : i32
    %c0_i32_0 = arith.constant 0 : i32
    %c0_i32_1 = arith.constant 0 : i32
    return %c0_i32, %c0_i32_0 : i32, i32
  }
  func.func @transform_2(%arg0: i32, %arg1: i32) -> (i32, i32) {
    %c0_i32 = arith.constant 0 : i32
    %c0_i32_0 = arith.constant 0 : i32
    %c0_i32_1 = arith.constant 0 : i32
    return %c0_i32, %c0_i32_0 : i32, i32
  }
  func.func @transform_3(%arg0: i32, %arg1: i32) -> (i32, i32, i32) {
    %c0_i32 = arith.constant 0 : i32
    %c0_i32_0 = arith.constant 0 : i32
    return %arg0, %c0_i32, %arg1 : i32, i32, i32
  }
  func.func @transform_4(%arg0: i32, %arg1: i32) -> (i32, i32) {
    %c0_i32 = arith.constant 0 : i32
    %c0_i32_0 = arith.constant 0 : i32
    return %c0_i32, %arg1 : i32, i32
  }
  func.func @transform_5(%arg0: i32, %arg1: i32) -> (i32, i32) {
    %c0_i32 = arith.constant 0 : i32
    %c0_i32_0 = arith.constant 0 : i32
    return %c0_i32, %arg1 : i32, i32
  }
  func.func @transform_6(%arg0: i32, %arg1: i32) -> (i32, i32) {
    %c0_i32 = arith.constant 0 : i32
    %c0_i32_0 = arith.constant 0 : i32
    return %c0_i32, %arg1 : i32, i32
  }
  func.func @transform_7(%arg0: i32, %arg1: i32) -> (i32, i32, i32) {
    %c0_i32 = arith.constant 0 : i32
    %c0_i32_0 = arith.constant 0 : i32
    return %arg0, %c0_i32, %arg1 : i32, i32, i32
  }
  func.func @transform_8(%arg0: i32, %arg1: i32) -> (i32, i32, i32) {
    %c0_i32 = arith.constant 0 : i32
    %c0_i32_0 = arith.constant 0 : i32
    return %arg0, %c0_i32, %arg1 : i32, i32, i32
  }
}

</mosaic_0001>

<bundles_post_ra>
// kernel: conv_lstm_cell.1
= control target key start
LH: loop header
LB: loop body
LE: loop exit
PB: predicated region body
PF: predicated region fallthrough
CT: control target
= control target key end

     0   :  { %s1149_s27 = smov 0   ;;  %s1151_s28 = smov 0   ;;  %s1323_s0 = inlined_call_operand.vmem [shape: f32[2,108,256], index: 0, kind: input, shape index: {}]   ;;  %s1324_s1 = inlined_call_operand.vmem [shape: f32[32,108], index: 1, kind: input, shape index: {}]   ;;  %s1325_s2 = inlined_call_operand.vmem [shape: f32[32,1], index: 2, kind: input, shape index: {}]   ;;  %s1326_s3 = inlined_call_operand.vmem [shape: f32[2,8,256], index: 3, kind: input, shape index: {}]   ;;  %s1327_s4 = inlined_call_operand.vmem [shape: f32[8,256], index: 4, kind: input, shape index: {}]   ;;  %s1328_s5 = inlined_call_operand.vmem [shape: f32[8,256], index: 5, kind: input, shape index: {}]   ;;  %s1329_s6 = inlined_call_operand.vmem [shape: f32[8,256], index: 6, kind: input, shape index: {}]   ;;  %s1330_s7 = inlined_call_operand.vmem [shape: f32[2,8,256], index: 7, kind: output, shape index: {0}]   ;;  %s1331_s8 = inlined_call_operand.vmem [shape: f32[2,8,256], index: 8, kind: output, shape index: {1}]  }
   0x1   :  { %s1153_s29 = smov 0  }
   0x2 LB: > { %s31_s30 = sadd.s32 1, %s1097_s28  ;;  %p962_p0 = scmp.ge.s32.totalorder %s1101_s29, 1  ;;  %s1101_s29 = sphi %s1153_s29, %s19_s29   ;;  %s1097_s28 = sphi %s1151_s28, %s1337_s28   ;;  %s1093_s27 = sphi %s1149_s27, %s1336_s27  }
   0x3   : > { %p33_p1 = scmp.ge.s32.totalorder %s31_s30, 2  ;;  %p338_p2 = scmp.lt.s32.totalorder %s1101_s29, 3 }
   0x5   : > { %s1339_s30 = smov (%p33_p1, %s31_s30), 0  ;;  %p339_p3 = pnand %p962_p0, %p338_p2 }
   0x6   : > { %p414_p4 = scmp.lt.s32.totalorder (!%p339_p3), %s1093_s27, 1 }
   0x7   : > { %342 = sbr.rel (%p339_p3) target bundleno = 252 (0xfc), region = 48 }
   0xc   : > { %s1341_s27 = smov (!%p414_p4, %s1093_s27), 1  ;;  %v503_v0 = vld [vmem:[%s1325_s2] sm:$0xff]  ;;  %v1103_v1 = vmov 0   ;;  %vm540_vm0 = vcmask 1043456   ;;  %v504_v26 = vld [vmem:[%s1325_s2 + $0x8] sm:$0xff]  ;;  %vm527_vm1 = vcmask 883712  }
   0xd   : > { %s1019_s11 = smul.u32 224, %s1341_s27  ;;  %1045 = vset.pattern.permute.xlu0 %v1103_v1  ;;  %1046 = vset.pattern.permute.xlu1 %v1103_v1  ;;  %v471_v31 = vld [vmem:[%s1324_s1] sm:$0xff]  ;;  %v473_v32 = vld [vmem:[%s1324_s1 + $0x10] sm:$0xff]  ;;  %v472_v34 = vld [vmem:[%s1324_s1 + $0x8] sm:$0xff] }
   0xe   : > { %509 = vperm.xlu0 %1045, %v503_v0   ;;  %v505_v33 = vld [vmem:[%s1325_s2 + $0x10] sm:$0xff]  ;;  %v474_v35 = vld [vmem:[%s1324_s1 + $0x18] sm:$0xff]  ;;  %v607_v38 = vld [vmem:[%s1327_s4] sm:$0xff] }
   0xf   : > { %s1176_s14 = scalar_lea.vmem %s1323_s0, %s1019_s11  ;;  %519 = vperm.xlu1 %1046, %v505_v33   ;;  %v506_v36 = vld [vmem:[%s1325_s2 + $0x18] sm:$0xff]  ;;  %s1236_s11 = sshll.u32 %s1341_s27, 4  ;;  %v608_v40 = vld [vmem:[%s1327_s4 + $0x8] sm:$0xff]  ;;  %v609_v50 = vld [vmem:[%s1328_s5] sm:$0xff] }
  0x10   : > { %v501_v2 = vld [vmem:[%s1176_s14 + $0xd0] sm:$0xf]  ;;  %v502_v3 = vld [vmem:[%s1176_s14 + $0xd8] sm:$0xf]  ;;  %v499_v4 = vld [vmem:[%s1176_s14 + $0xc0] sm:$0xff]  ;;  %s469_s24 = scalar_lea.vmem %s1331_s8, %s1236_s11 }
  0x11   : > { %970 = vmatpush.msk.msra.mxu0 %vm540_vm0, %v501_v2  ;;  %975 = vmatpush.msk.msra.mxu1 %vm540_vm0, %v502_v3  ;;  %v500_v5 = vld [vmem:[%s1176_s14 + $0xc8] sm:$0xff]  ;;  %v497_v6 = vld [vmem:[%s1176_s14 + $0xb0] sm:$0xff]  ;;  %v498_v7 = vld [vmem:[%s1176_s14 + $0xb8] sm:$0xff] }
  0x12   : > { %991 = vmatpush.msk.msra.mxu2 %vm540_vm0, %v501_v2  ;;  %1005 = vmatpush.msk.msra.mxu3 %vm540_vm0, %v502_v3  ;;  %v495_v8 = vld [vmem:[%s1176_s14 + $0xa0] sm:$0xff]  ;;  %v496_v9 = vld [vmem:[%s1176_s14 + $0xa8] sm:$0xff]  ;;  %v493_v10 = vld [vmem:[%s1176_s14 + $0x90] sm:$0xff] }
  0x13   : > { %550 = vmatpush.msra.mxu0 %v499_v4  ;;  %579 = vmatpush.msra.mxu1 %v500_v5  ;;  %v494_v11 = vld [vmem:[%s1176_s14 + $0x98] sm:$0xff]  ;;  %v491_v12 = vld [vmem:[%s1176_s14 + $0x80] sm:$0xff]  ;;  %v492_v13 = vld [vmem:[%s1176_s14 + $0x88] sm:$0xff] }
  0x14   : > { %992 = vmatpush.msra.mxu2 %v499_v4  ;;  %1006 = vmatpush.msra.mxu3 %v500_v5  ;;  %v489_v14 = vld [vmem:[%s1176_s14 + $0x70] sm:$0xff]  ;;  %v490_v15 = vld [vmem:[%s1176_s14 + $0x78] sm:$0xff]  ;;  %v487_v16 = vld [vmem:[%s1176_s14 + $0x60] sm:$0xff] }
  0x15   : > { %551 = vmatpush.msra.mxu0 %v497_v6  ;;  %580 = vmatpush.msra.mxu1 %v498_v7  ;;  %v488_v17 = vld [vmem:[%s1176_s14 + $0x68] sm:$0xff]  ;;  %v485_v18 = vld [vmem:[%s1176_s14 + $0x50] sm:$0xff]  ;;  %v486_v19 = vld [vmem:[%s1176_s14 + $0x58] sm:$0xff] }
  0x16   : > { %993 = vmatpush.msra.mxu2 %v497_v6  ;;  %1007 = vmatpush.msra.mxu3 %v498_v7  ;;  %v483_v20 = vld [vmem:[%s1176_s14 + $0x40] sm:$0xff]  ;;  %v484_v21 = vld [vmem:[%s1176_s14 + $0x48] sm:$0xff]  ;;  %v481_v22 = vld [vmem:[%s1176_s14 + $0x30] sm:$0xff] }
  0x17   : > { %552 = vmatpush.msra.mxu0 %v495_v8  ;;  %581 = vmatpush.msra.mxu1 %v496_v9  ;;  %v482_v23 = vld [vmem:[%s1176_s14 + $0x38] sm:$0xff]  ;;  %v479_v24 = vld [vmem:[%s1176_s14 + $0x20] sm:$0xff]  ;;  %v480_v25 = vld [vmem:[%s1176_s14 + $0x28] sm:$0xff] }
  0x18   : > { %994 = vmatpush.msra.mxu2 %v495_v8  ;;  %1008 = vmatpush.msra.mxu3 %v496_v9  ;;  %v477_v27 = vld [vmem:[%s1176_s14 + $0x10] sm:$0xff]  ;;  %v478_v28 = vld [vmem:[%s1176_s14 + $0x18] sm:$0xff]  ;;  %v475_v29 = vld [vmem:[%s1176_s14] sm:$0xff] }
  0x19   : > { %553 = vmatpush.msra.mxu0 %v493_v10  ;;  %582 = vmatpush.msra.mxu1 %v494_v11  ;;  %v476_v30 = vld [vmem:[%s1176_s14 + $0x8] sm:$0xff]  ;;  %s431_s14 = scalar_lea.vmem %s1326_s3, %s1236_s11 }
  0x1a   : > { %995 = vmatpush.msra.mxu2 %v493_v10  ;;  %1009 = vmatpush.msra.mxu3 %v494_v11  ;;  %v1242_v37 = vld [vmem:[%s431_s14] sm:$0xff]  ;;  %v1247_v39 = vld [vmem:[%s431_s14 + $0x8] sm:$0xff]  ;;  %s459_s14 = scalar_lea.vmem %s1330_s7, %s1236_s11 }
  0x1b   : > { %554 = vmatpush.msra.mxu0 %v491_v12  ;;  %583 = vmatpush.msra.mxu1 %v492_v13  ;;  %v657_v42 = vmul.f32 %v607_v38, %v1242_v37  ;;  %v658_v43 = vmul.f32 %v608_v40, %v1247_v39  ;;  %v610_v51 = vld [vmem:[%s1328_s5 + $0x8] sm:$0xff]  ;;  %v613_v55 = vmul.f32 %v609_v50, %v1242_v37 }
  0x1c   : > { %996 = vmatpush.msra.mxu2 %v491_v12  ;;  %1010 = vmatpush.msra.mxu3 %v492_v13  ;;  %v614_v56 = vmul.f32 %v610_v51, %v1247_v39 }
  0x1d   : > { %555 = vmatpush.msra.mxu0 %v489_v14  ;;  %584 = vmatpush.msra.mxu1 %v490_v15 }
  0x1e   : > { %997 = vmatpush.msra.mxu2 %v489_v14  ;;  %1011 = vmatpush.msra.mxu3 %v490_v15 }
  0x1f   : > { %556 = vmatpush.msra.mxu0 %v487_v16  ;;  %585 = vmatpush.msra.mxu1 %v488_v17 }
  0x20   : > { %998 = vmatpush.msra.mxu2 %v487_v16  ;;  %1012 = vmatpush.msra.mxu3 %v488_v17 }
  0x21   : > { %557 = vmatpush.msra.mxu0 %v485_v18  ;;  %586 = vmatpush.msra.mxu1 %v486_v19 }
  0x22   : > { %999 = vmatpush.msra.mxu2 %v485_v18  ;;  %1013 = vmatpush.msra.mxu3 %v486_v19 }
  0x23   : > { %558 = vmatpush.msra.mxu0 %v483_v20  ;;  %587 = vmatpush.msra.mxu1 %v484_v21 }
  0x24   : > { %1000 = vmatpush.msra.mxu2 %v483_v20  ;;  %1014 = vmatpush.msra.mxu3 %v484_v21 }
  0x25   : > { %559 = vmatpush.msra.mxu0 %v481_v22  ;;  %588 = vmatpush.msra.mxu1 %v482_v23 }
  0x26   : > { %1001 = vmatpush.msra.mxu2 %v481_v22  ;;  %1015 = vmatpush.msra.mxu3 %v482_v23 }
  0x27   : > { %560 = vmatpush.msra.mxu0 %v479_v24  ;;  %589 = vmatpush.msra.mxu1 %v480_v25 }
  0x28   : > { %514 = vperm.xlu0 %1045, %v504_v26   ;;  %1002 = vmatpush.msra.mxu2 %v479_v24 }
  0x29   : > { %561 = vmatpush.msra.mxu0 %v477_v27  ;;  %590 = vmatpush.msra.mxu1 %v478_v28 }
  0x2a   : > { %1016 = vmatpush.msra.mxu3 %v480_v25  ;;  %1003 = vmatpush.msra.mxu2 %v477_v27 }
  0x2b   : > { %562 = vmatpush.msra.mxu0 %v475_v29  ;;  %591 = vmatpush.msra.mxu1 %v476_v30 }
  0x2c   : > { %971 = vmatmul.msk.f32.vlgmr.msra.gmra.mxu0 %vm527_vm1, %v471_v31  ;;  %976 = vmatmul.msk.f32.vlgmr.msra.gmra.mxu1 %vm527_vm1, %v471_v31 }
  0x2d   : > { %1017 = vmatpush.msra.mxu3 %v478_v28  ;;  %1004 = vmatpush.msra.mxu2 %v475_v29 }
  0x2e   : > { %973 = vmatmul.msk.f32.vlgmr.msra.gmra.mxu2 %vm527_vm1, %v473_v32  ;;  %524 = vperm.xlu1 %1046, %v506_v36  }
  0x2f   : > { %1018 = vmatpush.msra.mxu3 %v476_v30 }
  0x30   : > { %978 = vmatmul.msk.f32.vlgmr.msra.gmra.mxu3 %vm527_vm1, %v473_v32 }
  0x34   : > { %972 = vmatmul.msk.f32.gmra.mxu0 %vm527_vm1, %v472_v34  ;;  %977 = vmatmul.msk.f32.gmra.mxu1 %vm527_vm1, %v472_v34 }
  0x36   : > { %974 = vmatmul.msk.f32.gmra.mxu2 %vm527_vm1, %v474_v35 }
  0x38   : > { %979 = vmatmul.msk.f32.gmra.mxu3 %vm527_vm1, %v474_v35 }
  0x80   : > { %v510_v41 = vpop.permute.xlu0 %509 }
  0x81   : > { %v520_v12 = vpop.permute.xlu1 %519 }
  0x9a   : > { %v515_v54 = vpop.permute.xlu0 %514 }
  0xa9   : > { %v564_v44 = vpop.f32.mrf.mxu0  ;;  %v593_v45 = vpop.f32.mrf.mxu1 }
  0xaa   : > { %v565_v46 = vadd.f32 %v564_v44, %v510_v41  ;;  %v594_v47 = vadd.f32 %v593_v45, %v510_v41 }
  0xac   : > { %v659_v48 = vadd.f32 %v657_v42, %v565_v46  ;;  %v660_v49 = vadd.f32 %v658_v43, %v594_v47 }
  0xae   : > { %v982_v52 = vmul.f32 -1.442695, %v659_v48  ;;  %v983_v53 = vmul.f32 -1.442695, %v660_v49 }
  0xb0   : > { %1047 = vpow2.f32 %v982_v52 }
  0xb1   : > { %1049 = vpow2.f32 %v983_v53  ;;  %v567_v57 = vpop.f32.mrf.mxu0  ;;  %v596_v58 = vpop.f32.mrf.mxu1 }
  0xb2   : > { %v568_v59 = vadd.f32 %v567_v57, %v515_v54  ;;  %v597_v60 = vadd.f32 %v596_v58, %v515_v54  ;;  %v570_v13 = vpop.f32.mrf.mxu2 }
  0xb3   : > { %v599_v16 = vpop.f32.mrf.mxu3  ;;  %v571_v18 = vadd.f32 %v570_v13, %v520_v12 }
  0xb4   : > { %v615_v61 = vadd.f32 %v613_v55, %v568_v59  ;;  %v616_v62 = vadd.f32 %v614_v56, %v597_v60  ;;  %v600_v20 = vadd.f32 %v599_v16, %v520_v12  ;;  %v525_v60 = vpop.permute.xlu1 %524 }
  0xb6   : > { %v1048_v63 = vpop.eup %1047  ;;  %v980_v0 = vmul.f32 -1.442695, %v615_v61  ;;  %v981_v3 = vmul.f32 -1.442695, %v616_v62  ;;  %v611_v62 = vld [vmem:[%s1329_s6] sm:$0xff] }
  0xb7   : > { %v1050_v1 = vpop.eup %1049  ;;  %v667_v2 = vadd.f32 1.0, %v1048_v63 }
  0xb8   : > { %v1262_v4 = vadd.f32 1.0, %v1050_v1  ;;  %1051 = vpow2.f32 %v980_v0 }
  0xb9   : > { %1053 = vrcp.f32 %v667_v2  ;;  %vm674_vm3 = vweird.f32 %v667_v2  ;;  %v678_v25 = vand.u32 2147483647, %v667_v2  ;;  %v680_v26 = vand.u32 2147483648, %v667_v2 }
  0xba   : > { %1055 = vrcp.f32 %v1262_v4  ;;  %vm689_vm4 = vweird.f32 %v1262_v4  ;;  %v693_v29 = vand.u32 2147483647, %v1262_v4  ;;  %v695_v34 = vand.u32 2147483648, %v1262_v4  ;;  %v573_v61 = vpop.f32.mrf.mxu2 }
  0xbb   : > { %1057 = vpow2.f32 %v981_v3  ;;  %vm679_vm8 = vcmp.eq.f32.partialorder %v678_v25, 8.507059e+37  ;;  %v681_v41 = vor.u32 1.1754944e-38, %v680_v26 }
  0xbc   : > { %v696_v52 = vor.u32 1.1754944e-38, %v695_v34  ;;  %vm694_vm14 = vcmp.eq.f32.partialorder %v693_v29, 8.507059e+37 }
  0xbe   : > { %v1052_v5 = vpop.eup %1051 }
  0xbf   : > { %v1054_v6 = vpop.eup %1053  ;;  %v623_v7 = vadd.f32 1.0, %v1052_v5  ;;  %v602_v5 = vpop.f32.mrf.mxu3 }
  0xc0   : > { %v1265_v8 = vpop.eup %1055  ;;  %v670_v9 = vmul.f32 %v1054_v6, %v667_v2  ;;  %vm675_vm2 = vweird.f32 %v1054_v6 }
  0xc1   : > { %v1058_v10 = vpop.eup %1057  ;;  %v685_v11 = vmul.f32 %v1265_v8, %v1262_v4  ;;  %1059 = vrcp.f32 %v623_v7  ;;  %v636_v30 = vand.u32 2147483648, %v623_v7  ;;  %vm1276_vm5 = vmor %vm674_vm3, %vm675_vm2  ;;  %vm690_vm6 = vweird.f32 %v1265_v8 }
  0xc2   : > { %v671_v14 = vsub.f32 1.0, %v670_v9  ;;  %v1269_v15 = vadd.f32 1.0, %v1058_v10  ;;  %v634_v38 = vand.u32 2147483647, %v623_v7  ;;  %vm630_vm9 = vweird.f32 %v623_v7  ;;  %vm1287_vm10 = vmor %vm689_vm4, %vm690_vm6 }
  0xc3   : > { %v686_v17 = vsub.f32 1.0, %v685_v11  ;;  %v637_v45 = vor.u32 1.1754944e-38, %v636_v30  ;;  %v603_v9 = vadd.f32 %v602_v5, %v525_v60 }
  0xc4   : > { %1061 = vrcp.f32 %v1269_v15  ;;  %v672_v19 = vmul.f32 %v1054_v6, %v671_v14  ;;  %v649_v46 = vand.u32 2147483647, %v1269_v15  ;;  %v651_v47 = vand.u32 2147483648, %v1269_v15 }
  0xc5   : > { %v687_v22 = vmul.f32 %v1265_v8, %v686_v17  ;;  %1063 = vtanh.f32 %v571_v18  ;;  %vm635_vm13 = vcmp.eq.f32.partialorder %v634_v38, 8.507059e+37  ;;  %vm645_vm15 = vweird.f32 %v1269_v15 }
  0xc6   : > { %v673_v24 = vadd.f32 %v1054_v6, %v672_v19  ;;  %1065 = vtanh.f32 %v600_v20  ;;  %v652_v59 = vor.u32 1.1754944e-38, %v651_v47  ;;  %vm650_vm1 = vcmp.eq.f32.partialorder %v649_v46, 8.507059e+37 }
  0xc7   : > { %v1060_v21 = vpop.eup %1059  ;;  %v688_v33 = vadd.f32 %v1265_v8, %v687_v22 }
  0xc8   : > { %v626_v23 = vmul.f32 %v1060_v21, %v623_v7  ;;  %v677_v36 = vsel %vm1276_vm5, %v1054_v6, %v673_v24  ;;  %vm631_vm7 = vweird.f32 %v1060_v21  ;;  %v612_v6 = vld [vmem:[%s1329_s6 + $0x8] sm:$0xff] }
  0xc9   : > { %v682_v50 = vsel %vm679_vm8, %v681_v41, %v677_v36  ;;  %v692_v51 = vsel %vm1287_vm10, %v1265_v8, %v688_v33  ;;  %vm632_vm11 = vmor %vm630_vm9, %vm631_vm7 }
  0xca   : > { %v1062_v27 = vpop.eup %1061  ;;  %v627_v28 = vsub.f32 1.0, %v626_v23  ;;  %v697_v57 = vsel %vm694_vm14, %v696_v52, %v692_v51 }
  0xcb   : > { %v641_v31 = vmul.f32 %v1062_v27, %v1269_v15  ;;  %v1064_v42 = vpop.eup %1063  ;;  %vm646_vm12 = vweird.f32 %v1062_v27 }
  0xcc   : > { %v628_v35 = vmul.f32 %v1060_v21, %v627_v28  ;;  %v1066_v48 = vpop.eup %1065  ;;  %v701_v56 = vmul.f32 %v1064_v42, %v682_v50  ;;  %vm647_vm0 = vmor %vm645_vm15, %vm646_vm12 }
  0xcd   : > { %v642_v40 = vsub.f32 1.0, %v641_v31  ;;  %v702_v2 = vmul.f32 %v1066_v48, %v697_v57 }
  0xce   : > { %v629_v44 = vadd.f32 %v1060_v21, %v628_v35 }
  0xcf   : > { %v643_v49 = vmul.f32 %v1062_v27, %v642_v40 }
  0xd0   : > { %v633_v53 = vsel %vm632_vm11, %v1060_v21, %v629_v44 }
  0xd1   : > { %v638_v54 = vsel %vm635_vm13, %v637_v45, %v633_v53  ;;  %v644_v55 = vadd.f32 %v1062_v27, %v643_v49 }
  0xd2   : > { %v655_v58 = vmul.f32 %v638_v54, %v1242_v37  ;;  %v574_v37 = vadd.f32 %v573_v61, %v525_v60 }
  0xd3   : > { %v648_v63 = vsel %vm647_vm0, %v1062_v27, %v644_v55 }
  0xd4   : > { %v703_v0 = vadd.f32 %v701_v56, %v655_v58  ;;  %v653_v1 = vsel %vm650_vm1, %v652_v59, %v648_v63 }
  0xd5   : > { %v656_v3 = vmul.f32 %v653_v1, %v1247_v39 }
  0xd6   : > { %v705_v4 = vmul.f32 %v703_v0, %v611_v62  ;;  %753 = vst [vmem:[%s469_s24] sm:$0xff] %v703_v0 }
  0xd7   : > { %v704_v7 = vadd.f32 %v702_v2, %v656_v3 }
  0xd8   : > { %v707_v8 = vadd.f32 %v705_v4, %v574_v37 }
  0xd9   : > { %v706_v10 = vmul.f32 %v704_v7, %v612_v6  ;;  %754 = vst [vmem:[%s469_s24 + $0x8] sm:$0xff] %v704_v7 }
  0xda   : > { %v984_v11 = vmul.f32 -1.442695, %v707_v8 }
  0xdb   : > { %v708_v12 = vadd.f32 %v706_v10, %v603_v9 }
  0xdc   : > { %1067 = vpow2.f32 %v984_v11 }
  0xdd   : > { %v985_v13 = vmul.f32 -1.442695, %v708_v12 }
  0xdf   : > { %1069 = vpow2.f32 %v985_v13 }
  0xe2   : > { %v1068_v14 = vpop.eup %1067 }
  0xe3   : > { %v715_v39 = vadd.f32 1.0, %v1068_v14 }
  0xe5   : > { %v1070_v15 = vpop.eup %1069  ;;  %1071 = vrcp.f32 %v715_v39  ;;  %v728_v21 = vand.u32 2147483648, %v715_v39  ;;  %v726_v24 = vand.u32 2147483647, %v715_v39  ;;  %vm722_vm3 = vweird.f32 %v715_v39 }
  0xe6   : > { %v716_v16 = vadd.f32 1.0, %v1070_v15 }
  0xe7   : > { %v729_v28 = vor.u32 1.1754944e-38, %v728_v21  ;;  %vm727_vm6 = vcmp.eq.f32.partialorder %v726_v24, 8.507059e+37 }
  0xe8   : > { %1073 = vrcp.f32 %v716_v16  ;;  %v743_v27 = vand.u32 2147483648, %v716_v16  ;;  %v741_v30 = vand.u32 2147483647, %v716_v16  ;;  %vm737_vm7 = vweird.f32 %v716_v16 }
  0xe9   : > { %1075 = vtanh.f32 %v703_v0 }
  0xea   : > { %1077 = vtanh.f32 %v704_v7  ;;  %v744_v36 = vor.u32 1.1754944e-38, %v743_v27  ;;  %vm742_vm9 = vcmp.eq.f32.partialorder %v741_v30, 8.507059e+37 }
  0xeb   : > { %v1072_v17 = vpop.eup %1071 }
  0xec   : > { %v718_v18 = vmul.f32 %v1072_v17, %v715_v39  ;;  %vm723_vm2 = vweird.f32 %v1072_v17 }
  0xed   : > { %vm724_vm4 = vmor %vm722_vm3, %vm723_vm2 }
  0xee   : > { %v1074_v19 = vpop.eup %1073  ;;  %v719_v20 = vsub.f32 1.0, %v718_v18 }
  0xef   : > { %v733_v22 = vmul.f32 %v1074_v19, %v716_v16  ;;  %vm738_vm5 = vweird.f32 %v1074_v19  ;;  %v1076_v32 = vpop.eup %1075 }
  0xf0   : > { %v720_v23 = vmul.f32 %v1072_v17, %v719_v20  ;;  %vm739_vm8 = vmor %vm737_vm7, %vm738_vm5  ;;  %v1078_v40 = vpop.eup %1077 }
  0xf1   : > { %v734_v25 = vsub.f32 1.0, %v733_v22 }
  0xf2   : > { %v721_v26 = vadd.f32 %v1072_v17, %v720_v23 }
  0xf3   : > { %v735_v29 = vmul.f32 %v1074_v19, %v734_v25 }
  0xf4   : > { %v725_v31 = vsel %vm724_vm4, %v1072_v17, %v721_v26 }
  0xf5   : > { %v730_v33 = vsel %vm727_vm6, %v729_v28, %v725_v31  ;;  %v736_v34 = vadd.f32 %v1074_v19, %v735_v29 }
  0xf6   : > { %v749_v35 = vmul.f32 %v1076_v32, %v730_v33 }
  0xf7   : > { %v740_v38 = vsel %vm739_vm8, %v1074_v19, %v736_v34 }
  0xf8   : > { %751 = vst [vmem:[%s459_s14] sm:$0xff] %v749_v35  ;;  %v745_v41 = vsel %vm742_vm9, %v744_v36, %v740_v38 }
  0xf9   : > { %v750_v42 = vmul.f32 %v1078_v40, %v745_v41 }
  0xfb   : > { %752 = vst [vmem:[%s459_s14 + $0x8] sm:$0xff] %v750_v42 }
  0xfc PF: > { %s19_s29 = sadd.s32 1, %s1101_s29   ;;  %s1336_s27 = smov %s1097_s28 }
  0xfd   : > { %p16_p5 = scmp.ge.s32.totalorder %s19_s29, 4   ;;  %s1337_s28 = smov %s1339_s30 }
  0xff   :  { %18 = sbr.rel (!%p16_p5) target bundleno = 2 (0x2), region = 102 }

</bundles_post_ra>
